<compile_context>
chip_gen: v7x
topology: tpu7x:2x2x1
jax: 0.10.0
libtpu: 0.0.40
codegen_flags: <defaults>
</compile_context>

<pallas_src>
import functools
import math

import jax
import jax.numpy as jnp
from jax.experimental import pallas as pl
from jax.experimental.pallas import tpu as pltpu


# ----------------------------- Fused kernel -----------------------------

def _layer_norm(h, g, b, eps=1e-5):
    # f32 mean/var/rsqrt (per review: keep reductions in float32 with bf16 MXU)
    mu = jnp.mean(h, axis=-1, keepdims=True)
    var = jnp.mean(jnp.square(h - mu), axis=-1, keepdims=True)
    return (h - mu) * jax.lax.rsqrt(var + eps) * g + b


def _encoder_layer_kernel(x_ref, wqkv_ref, wo_ref, w1_ref, w2_ref, vecs_ref,
                          o_ref, *, num_heads):
    B, S, D = x_ref.shape
    F = w1_ref.shape[1]
    hd = D // num_heads
    N = B * S

    # Fold batch/seq into rows (leading-dim reshape: free, no relayout).
    x = x_ref[...].reshape(N, D)                      # (N, D) f32, kept for residual
    x_bf = x.astype(jnp.bfloat16)

    # --- fused QKV projection: one (N, D) x (D, 3D) bf16 matmul, f32 accum ---
    # (1/sqrt(head_dim) already folded into the Q columns / bias at prep time)
    qkv = jnp.dot(x_bf, wqkv_ref[...],
                  preferred_element_type=jnp.float32) + vecs_ref[0:1, :3 * D]

    # --- multi-head self-attention, batched over B, per-head static unroll ---
    # src_mask is None in this EncoderLayer config; a non-None mask would be an
    # additive -1e30 bias on `s` before the softmax.
    attn_out = jnp.zeros((N, D), jnp.float32)
    for h in range(num_heads):
        q = qkv[:, h * hd:(h + 1) * hd].astype(jnp.bfloat16).reshape(B, S, hd)
        k = qkv[:, D + h * hd:D + (h + 1) * hd].astype(jnp.bfloat16).reshape(B, S, hd)
        v = qkv[:, 2 * D + h * hd:2 * D + (h + 1) * hd].astype(jnp.bfloat16).reshape(B, S, hd)

        # scores: contract last dims directly (no k.T materialization)
        s = jnp.einsum('bqd,bkd->bqk', q, k,
                       preferred_element_type=jnp.float32)       # (B, S, S) f32
        s = s - jnp.max(s, axis=-1, keepdims=True)
        p = jnp.exp(s)
        p = p * pl.reciprocal(jnp.sum(p, axis=-1, keepdims=True), approx=True)

        ctx = jnp.einsum('bqk,bkd->bqd', p.astype(jnp.bfloat16), v,
                         preferred_element_type=jnp.float32)     # (B, S, hd)

        # Fold this head's context straight through W_o's rows for head h:
        # attn_out += ctx_h @ W_o[h]  (no concat of head contexts needed).
        attn_out = attn_out + jnp.dot(
            ctx.reshape(N, hd).astype(jnp.bfloat16), wo_ref[h],
            preferred_element_type=jnp.float32)
    attn_out = attn_out + vecs_ref[1:2, :D]

    # --- residual + LayerNorm 1 (dropout = identity in eval mode) ---
    y1 = _layer_norm(x + attn_out, vecs_ref[4:5, :D], vecs_ref[5:6, :D])

    # --- FFN: relu(y1 @ W1 + b1) @ W2 + b2 (bf16 operands, f32 accum) ---
    f = jnp.dot(y1.astype(jnp.bfloat16), w1_ref[...],
                preferred_element_type=jnp.float32) + vecs_ref[2:3, :F]
    f = jnp.maximum(f, 0.0)
    f = jnp.dot(f.astype(jnp.bfloat16), w2_ref[...],
                preferred_element_type=jnp.float32) + vecs_ref[3:4, :D]

    # --- residual + LayerNorm 2 ---
    out = _layer_norm(y1 + f, vecs_ref[6:7, :D], vecs_ref[7:8, :D])
    o_ref[...] = out.reshape(B, S, D)


def encoder_layer(src, kparams, num_heads):
    """src: (B, S, D) float32 -> (B, S, D) float32. One fused pallas_call."""
    B, S, D = src.shape
    F = kparams['w1'].shape[1]
    H = num_heads
    hd = D // H
    PAD = kparams['vecs'].shape[1]
    kernel = functools.partial(_encoder_layer_kernel, num_heads=num_heads)

    def full(shape):
        n = len(shape)
        return pl.BlockSpec(shape, lambda i, _n=n: (0,) * _n)

    # Single grid step: whole (B, S, D) is one block; weights are VMEM-resident.
    return pl.pallas_call(
        kernel,
        out_shape=jax.ShapeDtypeStruct((B, S, D), jnp.float32),
        grid=(1,),
        in_specs=[
            full((B, S, D)),            # src
            full((D, 3 * D)),           # fused W_qkv (bf16, q-scale folded in)
            full((H, hd, D)),           # W_o grouped by head (bf16)
            full((D, F)),               # W1 (bf16)
            full((F, D)),               # W2 (bf16)
            full((8, PAD)),             # packed biases + LayerNorm params (f32)
        ],
        out_specs=full((B, S, D)),
        compiler_params=pltpu.CompilerParams(
            dimension_semantics=("arbitrary",),
            vmem_limit_bytes=32 * 1024 * 1024),
    )(src, kparams['wqkv'], kparams['wo'], kparams['w1'], kparams['w2'],
      kparams['vecs'])


# ----------------------------- Parameter prep -----------------------------

def prepare_kernel_params(params, num_heads):
    """One-time prep: fold softmax scale into W_q/b_q, cast weights to bf16,
    pack the 8 small bias/LN vectors into a single padded (8, 128k) array."""
    D = params['wo'].shape[0]
    F = params['w1'].shape[1]
    hd = D // num_heads
    scale = 1.0 / math.sqrt(hd)

    wqkv = params['wqkv'].at[:, :D].multiply(scale)
    bqkv = params['bqkv'].at[:D].multiply(scale)

    pad = max(128, ((max(3 * D, F) + 127) // 128) * 128)
    vecs = jnp.zeros((8, pad), jnp.float32)
    rows = [bqkv, params['bo'], params['b1'], params['b2'],
            params['ln1_g'], params['ln1_b'], params['ln2_g'], params['ln2_b']]
    for i, r in enumerate(rows):
        vecs = vecs.at[i, :r.shape[0]].set(r)

    return {
        'wqkv': wqkv.astype(jnp.bfloat16),
        'wo': params['wo'].reshape(num_heads, hd, D).astype(jnp.bfloat16),
        'w1': params['w1'].astype(jnp.bfloat16),
        'w2': params['w2'].astype(jnp.bfloat16),
        'vecs': vecs,
    }


# ----------------------------- Pure-JAX reference -----------------------------

def encoder_layer_ref(src, params, num_heads):
    B, S, D = src.shape
    hd = D // num_heads
    qkv = jnp.einsum('bsd,de->bse', src, params['wqkv']) + params['bqkv']
    q, k, v = jnp.split(qkv, 3, axis=-1)
    split = lambda t: t.reshape(B, S, num_heads, hd).transpose(0, 2, 1, 3)
    q, k, v = split(q), split(k), split(v)
    s = jnp.einsum('bhqd,bhkd->bhqk', q, k) / math.sqrt(hd)
    p = jax.nn.softmax(s, axis=-1)
    ctx = jnp.einsum('bhqk,bhkd->bhqd', p, v).transpose(0, 2, 1, 3).reshape(B, S, D)
    attn_out = ctx @ params['wo'] + params['bo']

    def ln(h, g, b):
        mu = jnp.mean(h, axis=-1, keepdims=True)
        var = jnp.mean(jnp.square(h - mu), axis=-1, keepdims=True)
        return (h - mu) * jax.lax.rsqrt(var + 1e-5) * g + b

    y1 = ln(src + attn_out, params['ln1_g'], params['ln1_b'])
    f = jnp.maximum(y1 @ params['w1'] + params['b1'], 0.0) @ params['w2'] + params['b2']
    return ln(y1 + f, params['ln2_g'], params['ln2_b'])


# ----------------------------- Parameter init -----------------------------

def init_params(key, d_model, ff_dim):
    def lin(k, din, dout):
        k1, k2 = jax.random.split(k)
        bound = 1.0 / math.sqrt(din)
        return (jax.random.uniform(k1, (din, dout), jnp.float32, -bound, bound),
                jax.random.uniform(k2, (dout,), jnp.float32, -bound, bound))

    ks = jax.random.split(key, 6)
    wq, bq = lin(ks[0], d_model, d_model)
    wk, bk = lin(ks[1], d_model, d_model)
    wv, bv = lin(ks[2], d_model, d_model)
    wo, bo = lin(ks[3], d_model, d_model)
    w1, b1 = lin(ks[4], d_model, ff_dim)
    w2, b2 = lin(ks[5], ff_dim, d_model)
    return {
        'wqkv': jnp.concatenate([wq, wk, wv], axis=1),   # fused (D, 3D), unscaled
        'bqkv': jnp.concatenate([bq, bk, bv]),
        'wo': wo, 'bo': bo,
        'w1': w1, 'b1': b1, 'w2': w2, 'b2': b2,
        'ln1_g': jnp.ones((d_model,), jnp.float32),
        'ln1_b': jnp.zeros((d_model,), jnp.float32),
        'ln2_g': jnp.ones((d_model,), jnp.float32),
        'ln2_b': jnp.zeros((d_model,), jnp.float32),
    }


# ----------------------------- Main -----------------------------

if __name__ == "__main__":
    D_MODEL, NUM_HEADS, FF_DIM = 32, 4, 64
    B, S = 2, 8

    key = jax.random.PRNGKey(0)
    kp, kx = jax.random.split(key)
    params = init_params(kp, D_MODEL, FF_DIM)
    src = jax.random.normal(kx, (B, S, D_MODEL), jnp.float32)

    kparams = prepare_kernel_params(params, NUM_HEADS)    # one-time prep
    fwd = jax.jit(functools.partial(encoder_layer, num_heads=NUM_HEADS))
    out = fwd(src, kparams)
    jax.block_until_ready(out)

    ref = encoder_layer_ref(src, params, NUM_HEADS)
    assert out.shape == (B, S, D_MODEL), out.shape
    assert bool(jnp.all(jnp.isfinite(out)))
    # bf16 MXU operands + approx softmax reciprocal -> ~1e-2-level deviation
    # from the f32 reference is expected; tolerance set accordingly.
    err = float(jnp.max(jnp.abs(out - ref)))
    assert bool(jnp.allclose(out, ref, atol=3e-2, rtol=3e-2)), err
    print("KERNEL_OK")
</pallas_src>

<mosaic_0001>
module attributes {stable_mosaic.version = 11 : i64} {
  func.func @_encoder_layer_kernel(%arg0: i32, %arg1: memref<2x8x32xf32, #tpu.memory_space<vmem>>, %arg2: memref<32x96xbf16, #tpu.memory_space<vmem>>, %arg3: memref<4x8x32xbf16, #tpu.memory_space<vmem>>, %arg4: memref<32x64xbf16, #tpu.memory_space<vmem>>, %arg5: memref<64x32xbf16, #tpu.memory_space<vmem>>, %arg6: memref<8x128xf32, #tpu.memory_space<vmem>>, %arg7: memref<2x8x32xf32, #tpu.memory_space<vmem>>) attributes {dimension_semantics = [#tpu.dimension_semantics<arbitrary>], iteration_bounds = array<i64: 1>, scalar_prefetch = 0 : i64, scratch_operands = 0 : i64, tpu.core_type = #tpu.core_type<tc>, window_params = [{pipeline_mode = #tpu.pipeline_mode<synchronous>, transform_indices = @transform_0, window_bounds = array<i64: 2, 8, 32>}, {pipeline_mode = #tpu.pipeline_mode<synchronous>, transform_indices = @transform_1, window_bounds = array<i64: 32, 96>}, {pipeline_mode = #tpu.pipeline_mode<synchronous>, transform_indices = @transform_2, window_bounds = array<i64: 4, 8, 32>}, {pipeline_mode = #tpu.pipeline_mode<synchronous>, transform_indices = @transform_3, window_bounds = array<i64: 32, 64>}, {pipeline_mode = #tpu.pipeline_mode<synchronous>, transform_indices = @transform_4, window_bounds = array<i64: 64, 32>}, {pipeline_mode = #tpu.pipeline_mode<synchronous>, transform_indices = @transform_5, window_bounds = array<i64: 8, 128>}, {pipeline_mode = #tpu.pipeline_mode<synchronous>, transform_indices = @transform_6, window_bounds = array<i64: 2, 8, 32>}]} {
    %c0 = arith.constant 0 : index
    %c0_0 = arith.constant 0 : index
    %c0_1 = arith.constant 0 : index
    %0 = vector.load %arg1[%c0, %c0_0, %c0_1] : memref<2x8x32xf32, #tpu.memory_space<vmem>>, vector<2x8x32xf32>
    %1 = vector.shape_cast %0 : vector<2x8x32xf32> to vector<16x32xf32>
    %2 = arith.truncf %1 : vector<16x32xf32> to vector<16x32xbf16>
    %c0_2 = arith.constant 0 : index
    %c0_3 = arith.constant 0 : index
    %3 = vector.load %arg2[%c0_2, %c0_3] : memref<32x96xbf16, #tpu.memory_space<vmem>>, vector<32x96xbf16>
    %cst = arith.constant dense<0.000000e+00> : vector<16x96xf32>
    %4 = tpu.matmul %2, %3, %cst {dimension_numbers = #tpu.dot_dimension_numbers<[1], [0], [0], [1], [0, 0, 1, 1], [], []>} : vector<16x32xbf16>, vector<32x96xbf16>, vector<16x96xf32> -> vector<16x96xf32>
    %c0_4 = arith.constant 0 : index
    %c0_5 = arith.constant 0 : index
    %5 = vector.load %arg6[%c0_4, %c0_5] : memref<8x128xf32, #tpu.memory_space<vmem>>, vector<1x96xf32>
    %6 = vector.broadcast %5 : vector<1x96xf32> to vector<16x96xf32>
    %7 = arith.addf %4, %6 : vector<16x96xf32>
    %cst_6 = arith.constant 0.000000e+00 : f32
    %8 = vector.broadcast %cst_6 : f32 to vector<16x32xf32>
    %9 = vector.extract_strided_slice %7 {offsets = [0, 0], sizes = [16, 8], strides = [1, 1]} : vector<16x96xf32> to vector<16x8xf32>
    %10 = arith.truncf %9 : vector<16x8xf32> to vector<16x8xbf16>
    %11 = vector.shape_cast %10 : vector<16x8xbf16> to vector<2x8x8xbf16>
    %12 = vector.extract_strided_slice %7 {offsets = [0, 32], sizes = [16, 8], strides = [1, 1]} : vector<16x96xf32> to vector<16x8xf32>
    %13 = arith.truncf %12 : vector<16x8xf32> to vector<16x8xbf16>
    %14 = vector.shape_cast %13 : vector<16x8xbf16> to vector<2x8x8xbf16>
    %15 = vector.extract_strided_slice %7 {offsets = [0, 64], sizes = [16, 8], strides = [1, 1]} : vector<16x96xf32> to vector<16x8xf32>
    %16 = arith.truncf %15 : vector<16x8xf32> to vector<16x8xbf16>
    %17 = vector.shape_cast %16 : vector<16x8xbf16> to vector<2x8x8xbf16>
    "tpu.trace_start"() <{level = 10 : i32, message = "bqd,bkd->bqk"}> : () -> ()
    %cst_7 = arith.constant dense<0.000000e+00> : vector<2x8x8xf32>
    %18 = tpu.matmul %11, %14, %cst_7 {dimension_numbers = #tpu.dot_dimension_numbers<[2], [2], [1], [1], [0, 0, 0, 1, 1, 1], [0], [0]>} : vector<2x8x8xbf16>, vector<2x8x8xbf16>, vector<2x8x8xf32> -> vector<2x8x8xf32>
    "tpu.trace_stop"() : () -> ()
    %cst_8 = arith.constant dense<0xFF800000> : vector<2x8xf32>
    %19 = vector.multi_reduction <maximumf>, %18, %cst_8 [2] : vector<2x8x8xf32> to vector<2x8xf32>
    %20 = vector.shape_cast %19 : vector<2x8xf32> to vector<2x8x1xf32>
    %21 = vector.broadcast %20 : vector<2x8x1xf32> to vector<2x8x8xf32>
    %22 = arith.subf %18, %21 : vector<2x8x8xf32>
    %23 = math.exp %22 : vector<2x8x8xf32>
    %cst_9 = arith.constant dense<0.000000e+00> : vector<2x8xf32>
    %24 = vector.multi_reduction <add>, %23, %cst_9 [2] : vector<2x8x8xf32> to vector<2x8xf32>
    %25 = vector.shape_cast %24 : vector<2x8xf32> to vector<2x8x1xf32>
    %26 = tpu.reciprocal %25 {approx = true} : vector<2x8x1xf32> -> vector<2x8x1xf32>
    %27 = vector.broadcast %26 : vector<2x8x1xf32> to vector<2x8x8xf32>
    %28 = arith.mulf %23, %27 : vector<2x8x8xf32>
    %29 = arith.truncf %28 : vector<2x8x8xf32> to vector<2x8x8xbf16>
    "tpu.trace_start"() <{level = 10 : i32, message = "bqk,bkd->bqd"}> : () -> ()
    %cst_10 = arith.constant dense<0.000000e+00> : vector<2x8x8xf32>
    %30 = tpu.matmul %29, %17, %cst_10 {dimension_numbers = #tpu.dot_dimension_numbers<[2], [1], [1], [2], [0, 0, 0, 1, 1, 2], [0], [0]>} : vector<2x8x8xbf16>, vector<2x8x8xbf16>, vector<2x8x8xf32> -> vector<2x8x8xf32>
    "tpu.trace_stop"() : () -> ()
    %31 = vector.shape_cast %30 : vector<2x8x8xf32> to vector<16x8xf32>
    %32 = arith.truncf %31 : vector<16x8xf32> to vector<16x8xbf16>
    %c0_11 = arith.constant 0 : index
    %c0_12 = arith.constant 0 : index
    %c0_13 = arith.constant 0 : index
    %33 = vector.load %arg3[%c0_11, %c0_12, %c0_13] : memref<4x8x32xbf16, #tpu.memory_space<vmem>>, vector<1x8x32xbf16>
    %34 = vector.shape_cast %33 : vector<1x8x32xbf16> to vector<8x32xbf16>
    %cst_14 = arith.constant dense<0.000000e+00> : vector<16x32xf32>
    %35 = tpu.matmul %32, %34, %cst_14 {dimension_numbers = #tpu.dot_dimension_numbers<[1], [0], [0], [1], [0, 0, 1, 1], [], []>} : vector<16x8xbf16>, vector<8x32xbf16>, vector<16x32xf32> -> vector<16x32xf32>
    %36 = arith.addf %8, %35 : vector<16x32xf32>
    %37 = vector.extract_strided_slice %7 {offsets = [0, 8], sizes = [16, 8], strides = [1, 1]} : vector<16x96xf32> to vector<16x8xf32>
    %38 = arith.truncf %37 : vector<16x8xf32> to vector<16x8xbf16>
    %39 = vector.shape_cast %38 : vector<16x8xbf16> to vector<2x8x8xbf16>
    %40 = vector.extract_strided_slice %7 {offsets = [0, 40], sizes = [16, 8], strides = [1, 1]} : vector<16x96xf32> to vector<16x8xf32>
    %41 = arith.truncf %40 : vector<16x8xf32> to vector<16x8xbf16>
    %42 = vector.shape_cast %41 : vector<16x8xbf16> to vector<2x8x8xbf16>
    %43 = vector.extract_strided_slice %7 {offsets = [0, 72], sizes = [16, 8], strides = [1, 1]} : vector<16x96xf32> to vector<16x8xf32>
    %44 = arith.truncf %43 : vector<16x8xf32> to vector<16x8xbf16>
    %45 = vector.shape_cast %44 : vector<16x8xbf16> to vector<2x8x8xbf16>
    "tpu.trace_start"() <{level = 10 : i32, message = "bqd,bkd->bqk"}> : () -> ()
    %cst_15 = arith.constant dense<0.000000e+00> : vector<2x8x8xf32>
    %46 = tpu.matmul %39, %42, %cst_15 {dimension_numbers = #tpu.dot_dimension_numbers<[2], [2], [1], [1], [0, 0, 0, 1, 1, 1], [0], [0]>} : vector<2x8x8xbf16>, vector<2x8x8xbf16>, vector<2x8x8xf32> -> vector<2x8x8xf32>
    "tpu.trace_stop"() : () -> ()
    %cst_16 = arith.constant dense<0xFF800000> : vector<2x8xf32>
    %47 = vector.multi_reduction <maximumf>, %46, %cst_16 [2] : vector<2x8x8xf32> to vector<2x8xf32>
    %48 = vector.shape_cast %47 : vector<2x8xf32> to vector<2x8x1xf32>
    %49 = vector.broadcast %48 : vector<2x8x1xf32> to vector<2x8x8xf32>
    %50 = arith.subf %46, %49 : vector<2x8x8xf32>
    %51 = math.exp %50 : vector<2x8x8xf32>
    %cst_17 = arith.constant dense<0.000000e+00> : vector<2x8xf32>
    %52 = vector.multi_reduction <add>, %51, %cst_17 [2] : vector<2x8x8xf32> to vector<2x8xf32>
    %53 = vector.shape_cast %52 : vector<2x8xf32> to vector<2x8x1xf32>
    %54 = tpu.reciprocal %53 {approx = true} : vector<2x8x1xf32> -> vector<2x8x1xf32>
    %55 = vector.broadcast %54 : vector<2x8x1xf32> to vector<2x8x8xf32>
    %56 = arith.mulf %51, %55 : vector<2x8x8xf32>
    %57 = arith.truncf %56 : vector<2x8x8xf32> to vector<2x8x8xbf16>
    "tpu.trace_start"() <{level = 10 : i32, message = "bqk,bkd->bqd"}> : () -> ()
    %cst_18 = arith.constant dense<0.000000e+00> : vector<2x8x8xf32>
    %58 = tpu.matmul %57, %45, %cst_18 {dimension_numbers = #tpu.dot_dimension_numbers<[2], [1], [1], [2], [0, 0, 0, 1, 1, 2], [0], [0]>} : vector<2x8x8xbf16>, vector<2x8x8xbf16>, vector<2x8x8xf32> -> vector<2x8x8xf32>
    "tpu.trace_stop"() : () -> ()
    %59 = vector.shape_cast %58 : vector<2x8x8xf32> to vector<16x8xf32>
    %60 = arith.truncf %59 : vector<16x8xf32> to vector<16x8xbf16>
    %c1 = arith.constant 1 : index
    %c0_19 = arith.constant 0 : index
    %c0_20 = arith.constant 0 : index
    %61 = vector.load %arg3[%c1, %c0_19, %c0_20] : memref<4x8x32xbf16, #tpu.memory_space<vmem>>, vector<1x8x32xbf16>
    %62 = vector.shape_cast %61 : vector<1x8x32xbf16> to vector<8x32xbf16>
    %cst_21 = arith.constant dense<0.000000e+00> : vector<16x32xf32>
    %63 = tpu.matmul %60, %62, %cst_21 {dimension_numbers = #tpu.dot_dimension_numbers<[1], [0], [0], [1], [0, 0, 1, 1], [], []>} : vector<16x8xbf16>, vector<8x32xbf16>, vector<16x32xf32> -> vector<16x32xf32>
    %64 = arith.addf %36, %63 : vector<16x32xf32>
    %65 = vector.extract_strided_slice %7 {offsets = [0, 16], sizes = [16, 8], strides = [1, 1]} : vector<16x96xf32> to vector<16x8xf32>
    %66 = arith.truncf %65 : vector<16x8xf32> to vector<16x8xbf16>
    %67 = vector.shape_cast %66 : vector<16x8xbf16> to vector<2x8x8xbf16>
    %68 = vector.extract_strided_slice %7 {offsets = [0, 48], sizes = [16, 8], strides = [1, 1]} : vector<16x96xf32> to vector<16x8xf32>
    %69 = arith.truncf %68 : vector<16x8xf32> to vector<16x8xbf16>
    %70 = vector.shape_cast %69 : vector<16x8xbf16> to vector<2x8x8xbf16>
    %71 = vector.extract_strided_slice %7 {offsets = [0, 80], sizes = [16, 8], strides = [1, 1]} : vector<16x96xf32> to vector<16x8xf32>
    %72 = arith.truncf %71 : vector<16x8xf32> to vector<16x8xbf16>
    %73 = vector.shape_cast %72 : vector<16x8xbf16> to vector<2x8x8xbf16>
    "tpu.trace_start"() <{level = 10 : i32, message = "bqd,bkd->bqk"}> : () -> ()
    %cst_22 = arith.constant dense<0.000000e+00> : vector<2x8x8xf32>
    %74 = tpu.matmul %67, %70, %cst_22 {dimension_numbers = #tpu.dot_dimension_numbers<[2], [2], [1], [1], [0, 0, 0, 1, 1, 1], [0], [0]>} : vector<2x8x8xbf16>, vector<2x8x8xbf16>, vector<2x8x8xf32> -> vector<2x8x8xf32>
    "tpu.trace_stop"() : () -> ()
    %cst_23 = arith.constant dense<0xFF800000> : vector<2x8xf32>
    %75 = vector.multi_reduction <maximumf>, %74, %cst_23 [2] : vector<2x8x8xf32> to vector<2x8xf32>
    %76 = vector.shape_cast %75 : vector<2x8xf32> to vector<2x8x1xf32>
    %77 = vector.broadcast %76 : vector<2x8x1xf32> to vector<2x8x8xf32>
    %78 = arith.subf %74, %77 : vector<2x8x8xf32>
    %79 = math.exp %78 : vector<2x8x8xf32>
    %cst_24 = arith.constant dense<0.000000e+00> : vector<2x8xf32>
    %80 = vector.multi_reduction <add>, %79, %cst_24 [2] : vector<2x8x8xf32> to vector<2x8xf32>
    %81 = vector.shape_cast %80 : vector<2x8xf32> to vector<2x8x1xf32>
    %82 = tpu.reciprocal %81 {approx = true} : vector<2x8x1xf32> -> vector<2x8x1xf32>
    %83 = vector.broadcast %82 : vector<2x8x1xf32> to vector<2x8x8xf32>
    %84 = arith.mulf %79, %83 : vector<2x8x8xf32>
    %85 = arith.truncf %84 : vector<2x8x8xf32> to vector<2x8x8xbf16>
    "tpu.trace_start"() <{level = 10 : i32, message = "bqk,bkd->bqd"}> : () -> ()
    %cst_25 = arith.constant dense<0.000000e+00> : vector<2x8x8xf32>
    %86 = tpu.matmul %85, %73, %cst_25 {dimension_numbers = #tpu.dot_dimension_numbers<[2], [1], [1], [2], [0, 0, 0, 1, 1, 2], [0], [0]>} : vector<2x8x8xbf16>, vector<2x8x8xbf16>, vector<2x8x8xf32> -> vector<2x8x8xf32>
    "tpu.trace_stop"() : () -> ()
    %87 = vector.shape_cast %86 : vector<2x8x8xf32> to vector<16x8xf32>
    %88 = arith.truncf %87 : vector<16x8xf32> to vector<16x8xbf16>
    %c2 = arith.constant 2 : index
    %c0_26 = arith.constant 0 : index
    %c0_27 = arith.constant 0 : index
    %89 = vector.load %arg3[%c2, %c0_26, %c0_27] : memref<4x8x32xbf16, #tpu.memory_space<vmem>>, vector<1x8x32xbf16>
    %90 = vector.shape_cast %89 : vector<1x8x32xbf16> to vector<8x32xbf16>
    %cst_28 = arith.constant dense<0.000000e+00> : vector<16x32xf32>
    %91 = tpu.matmul %88, %90, %cst_28 {dimension_numbers = #tpu.dot_dimension_numbers<[1], [0], [0], [1], [0, 0, 1, 1], [], []>} : vector<16x8xbf16>, vector<8x32xbf16>, vector<16x32xf32> -> vector<16x32xf32>
    %92 = arith.addf %64, %91 : vector<16x32xf32>
    %93 = vector.extract_strided_slice %7 {offsets = [0, 24], sizes = [16, 8], strides = [1, 1]} : vector<16x96xf32> to vector<16x8xf32>
    %94 = arith.truncf %93 : vector<16x8xf32> to vector<16x8xbf16>
    %95 = vector.shape_cast %94 : vector<16x8xbf16> to vector<2x8x8xbf16>
    %96 = vector.extract_strided_slice %7 {offsets = [0, 56], sizes = [16, 8], strides = [1, 1]} : vector<16x96xf32> to vector<16x8xf32>
    %97 = arith.truncf %96 : vector<16x8xf32> to vector<16x8xbf16>
    %98 = vector.shape_cast %97 : vector<16x8xbf16> to vector<2x8x8xbf16>
    %99 = vector.extract_strided_slice %7 {offsets = [0, 88], sizes = [16, 8], strides = [1, 1]} : vector<16x96xf32> to vector<16x8xf32>
    %100 = arith.truncf %99 : vector<16x8xf32> to vector<16x8xbf16>
    %101 = vector.shape_cast %100 : vector<16x8xbf16> to vector<2x8x8xbf16>
    "tpu.trace_start"() <{level = 10 : i32, message = "bqd,bkd->bqk"}> : () -> ()
    %cst_29 = arith.constant dense<0.000000e+00> : vector<2x8x8xf32>
    %102 = tpu.matmul %95, %98, %cst_29 {dimension_numbers = #tpu.dot_dimension_numbers<[2], [2], [1], [1], [0, 0, 0, 1, 1, 1], [0], [0]>} : vector<2x8x8xbf16>, vector<2x8x8xbf16>, vector<2x8x8xf32> -> vector<2x8x8xf32>
    "tpu.trace_stop"() : () -> ()
    %cst_30 = arith.constant dense<0xFF800000> : vector<2x8xf32>
    %103 = vector.multi_reduction <maximumf>, %102, %cst_30 [2] : vector<2x8x8xf32> to vector<2x8xf32>
    %104 = vector.shape_cast %103 : vector<2x8xf32> to vector<2x8x1xf32>
    %105 = vector.broadcast %104 : vector<2x8x1xf32> to vector<2x8x8xf32>
    %106 = arith.subf %102, %105 : vector<2x8x8xf32>
    %107 = math.exp %106 : vector<2x8x8xf32>
    %cst_31 = arith.constant dense<0.000000e+00> : vector<2x8xf32>
    %108 = vector.multi_reduction <add>, %107, %cst_31 [2] : vector<2x8x8xf32> to vector<2x8xf32>
    %109 = vector.shape_cast %108 : vector<2x8xf32> to vector<2x8x1xf32>
    %110 = tpu.reciprocal %109 {approx = true} : vector<2x8x1xf32> -> vector<2x8x1xf32>
    %111 = vector.broadcast %110 : vector<2x8x1xf32> to vector<2x8x8xf32>
    %112 = arith.mulf %107, %111 : vector<2x8x8xf32>
    %113 = arith.truncf %112 : vector<2x8x8xf32> to vector<2x8x8xbf16>
    "tpu.trace_start"() <{level = 10 : i32, message = "bqk,bkd->bqd"}> : () -> ()
    %cst_32 = arith.constant dense<0.000000e+00> : vector<2x8x8xf32>
    %114 = tpu.matmul %113, %101, %cst_32 {dimension_numbers = #tpu.dot_dimension_numbers<[2], [1], [1], [2], [0, 0, 0, 1, 1, 2], [0], [0]>} : vector<2x8x8xbf16>, vector<2x8x8xbf16>, vector<2x8x8xf32> -> vector<2x8x8xf32>
    "tpu.trace_stop"() : () -> ()
    %115 = vector.shape_cast %114 : vector<2x8x8xf32> to vector<16x8xf32>
    %116 = arith.truncf %115 : vector<16x8xf32> to vector<16x8xbf16>
    %c3 = arith.constant 3 : index
    %c0_33 = arith.constant 0 : index
    %c0_34 = arith.constant 0 : index
    %117 = vector.load %arg3[%c3, %c0_33, %c0_34] : memref<4x8x32xbf16, #tpu.memory_space<vmem>>, vector<1x8x32xbf16>
    %118 = vector.shape_cast %117 : vector<1x8x32xbf16> to vector<8x32xbf16>
    %cst_35 = arith.constant dense<0.000000e+00> : vector<16x32xf32>
    %119 = tpu.matmul %116, %118, %cst_35 {dimension_numbers = #tpu.dot_dimension_numbers<[1], [0], [0], [1], [0, 0, 1, 1], [], []>} : vector<16x8xbf16>, vector<8x32xbf16>, vector<16x32xf32> -> vector<16x32xf32>
    %120 = arith.addf %92, %119 : vector<16x32xf32>
    %c1_36 = arith.constant 1 : index
    %c0_37 = arith.constant 0 : index
    %121 = vector.load %arg6[%c1_36, %c0_37] : memref<8x128xf32, #tpu.memory_space<vmem>>, vector<1x32xf32>
    %122 = vector.broadcast %121 : vector<1x32xf32> to vector<16x32xf32>
    %123 = arith.addf %120, %122 : vector<16x32xf32>
    %124 = arith.addf %1, %123 : vector<16x32xf32>
    %c4 = arith.constant 4 : index
    %c0_38 = arith.constant 0 : index
    %125 = vector.load %arg6[%c4, %c0_38] : memref<8x128xf32, #tpu.memory_space<vmem>>, vector<1x32xf32>
    %c5 = arith.constant 5 : index
    %c0_39 = arith.constant 0 : index
    %126 = vector.load %arg6[%c5, %c0_39] : memref<8x128xf32, #tpu.memory_space<vmem>>, vector<1x32xf32>
    %cst_40 = arith.constant dense<0.000000e+00> : vector<16xf32>
    %127 = vector.multi_reduction <add>, %124, %cst_40 [1] : vector<16x32xf32> to vector<16xf32>
    %128 = vector.shape_cast %127 : vector<16xf32> to vector<16x1xf32>
    %cst_41 = arith.constant 3.200000e+01 : f32
    %129 = vector.broadcast %cst_41 : f32 to vector<16x1xf32>
    %130 = arith.divf %128, %129 : vector<16x1xf32>
    %131 = vector.broadcast %130 : vector<16x1xf32> to vector<16x32xf32>
    %132 = arith.subf %124, %131 : vector<16x32xf32>
    %133 = arith.mulf %132, %132 : vector<16x32xf32>
    %cst_42 = arith.constant dense<0.000000e+00> : vector<16xf32>
    %134 = vector.multi_reduction <add>, %133, %cst_42 [1] : vector<16x32xf32> to vector<16xf32>
    %135 = vector.shape_cast %134 : vector<16xf32> to vector<16x1xf32>
    %cst_43 = arith.constant 3.200000e+01 : f32
    %136 = vector.broadcast %cst_43 : f32 to vector<16x1xf32>
    %137 = arith.divf %135, %136 : vector<16x1xf32>
    %138 = vector.broadcast %130 : vector<16x1xf32> to vector<16x32xf32>
    %139 = arith.subf %124, %138 : vector<16x32xf32>
    %cst_44 = arith.constant 9.99999974E-6 : f32
    %140 = vector.broadcast %cst_44 : f32 to vector<16x1xf32>
    %141 = arith.addf %137, %140 : vector<16x1xf32>
    %142 = math.rsqrt %141 : vector<16x1xf32>
    %143 = vector.broadcast %142 : vector<16x1xf32> to vector<16x32xf32>
    %144 = arith.mulf %139, %143 : vector<16x32xf32>
    %145 = vector.broadcast %125 : vector<1x32xf32> to vector<16x32xf32>
    %146 = arith.mulf %144, %145 : vector<16x32xf32>
    %147 = vector.broadcast %126 : vector<1x32xf32> to vector<16x32xf32>
    %148 = arith.addf %146, %147 : vector<16x32xf32>
    %149 = arith.truncf %148 : vector<16x32xf32> to vector<16x32xbf16>
    %c0_45 = arith.constant 0 : index
    %c0_46 = arith.constant 0 : index
    %150 = vector.load %arg4[%c0_45, %c0_46] : memref<32x64xbf16, #tpu.memory_space<vmem>>, vector<32x64xbf16>
    %cst_47 = arith.constant dense<0.000000e+00> : vector<16x64xf32>
    %151 = tpu.matmul %149, %150, %cst_47 {dimension_numbers = #tpu.dot_dimension_numbers<[1], [0], [0], [1], [0, 0, 1, 1], [], []>} : vector<16x32xbf16>, vector<32x64xbf16>, vector<16x64xf32> -> vector<16x64xf32>
    %c2_48 = arith.constant 2 : index
    %c0_49 = arith.constant 0 : index
    %152 = vector.load %arg6[%c2_48, %c0_49] : memref<8x128xf32, #tpu.memory_space<vmem>>, vector<1x64xf32>
    %153 = vector.broadcast %152 : vector<1x64xf32> to vector<16x64xf32>
    %154 = arith.addf %151, %153 : vector<16x64xf32>
    %cst_50 = arith.constant 0.000000e+00 : f32
    %155 = vector.broadcast %cst_50 : f32 to vector<16x64xf32>
    %156 = arith.maximumf %154, %155 : vector<16x64xf32>
    %157 = arith.truncf %156 : vector<16x64xf32> to vector<16x64xbf16>
    %c0_51 = arith.constant 0 : index
    %c0_52 = arith.constant 0 : index
    %158 = vector.load %arg5[%c0_51, %c0_52] : memref<64x32xbf16, #tpu.memory_space<vmem>>, vector<64x32xbf16>
    %cst_53 = arith.constant dense<0.000000e+00> : vector<16x32xf32>
    %159 = tpu.matmul %157, %158, %cst_53 {dimension_numbers = #tpu.dot_dimension_numbers<[1], [0], [0], [1], [0, 0, 1, 1], [], []>} : vector<16x64xbf16>, vector<64x32xbf16>, vector<16x32xf32> -> vector<16x32xf32>
    %c3_54 = arith.constant 3 : index
    %c0_55 = arith.constant 0 : index
    %160 = vector.load %arg6[%c3_54, %c0_55] : memref<8x128xf32, #tpu.memory_space<vmem>>, vector<1x32xf32>
    %161 = vector.broadcast %160 : vector<1x32xf32> to vector<16x32xf32>
    %162 = arith.addf %159, %161 : vector<16x32xf32>
    %163 = arith.addf %148, %162 : vector<16x32xf32>
    %c6 = arith.constant 6 : index
    %c0_56 = arith.constant 0 : index
    %164 = vector.load %arg6[%c6, %c0_56] : memref<8x128xf32, #tpu.memory_space<vmem>>, vector<1x32xf32>
    %c7 = arith.constant 7 : index
    %c0_57 = arith.constant 0 : index
    %165 = vector.load %arg6[%c7, %c0_57] : memref<8x128xf32, #tpu.memory_space<vmem>>, vector<1x32xf32>
    %cst_58 = arith.constant dense<0.000000e+00> : vector<16xf32>
    %166 = vector.multi_reduction <add>, %163, %cst_58 [1] : vector<16x32xf32> to vector<16xf32>
    %167 = vector.shape_cast %166 : vector<16xf32> to vector<16x1xf32>
    %cst_59 = arith.constant 3.200000e+01 : f32
    %168 = vector.broadcast %cst_59 : f32 to vector<16x1xf32>
    %169 = arith.divf %167, %168 : vector<16x1xf32>
    %170 = vector.broadcast %169 : vector<16x1xf32> to vector<16x32xf32>
    %171 = arith.subf %163, %170 : vector<16x32xf32>
    %172 = arith.mulf %171, %171 : vector<16x32xf32>
    %cst_60 = arith.constant dense<0.000000e+00> : vector<16xf32>
    %173 = vector.multi_reduction <add>, %172, %cst_60 [1] : vector<16x32xf32> to vector<16xf32>
    %174 = vector.shape_cast %173 : vector<16xf32> to vector<16x1xf32>
    %cst_61 = arith.constant 3.200000e+01 : f32
    %175 = vector.broadcast %cst_61 : f32 to vector<16x1xf32>
    %176 = arith.divf %174, %175 : vector<16x1xf32>
    %177 = vector.broadcast %169 : vector<16x1xf32> to vector<16x32xf32>
    %178 = arith.subf %163, %177 : vector<16x32xf32>
    %cst_62 = arith.constant 9.99999974E-6 : f32
    %179 = vector.broadcast %cst_62 : f32 to vector<16x1xf32>
    %180 = arith.addf %176, %179 : vector<16x1xf32>
    %181 = math.rsqrt %180 : vector<16x1xf32>
    %182 = vector.broadcast %181 : vector<16x1xf32> to vector<16x32xf32>
    %183 = arith.mulf %178, %182 : vector<16x32xf32>
    %184 = vector.broadcast %164 : vector<1x32xf32> to vector<16x32xf32>
    %185 = arith.mulf %183, %184 : vector<16x32xf32>
    %186 = vector.broadcast %165 : vector<1x32xf32> to vector<16x32xf32>
    %187 = arith.addf %185, %186 : vector<16x32xf32>
    %188 = vector.shape_cast %187 : vector<16x32xf32> to vector<2x8x32xf32>
    %c0_63 = arith.constant 0 : index
    %c0_64 = arith.constant 0 : index
    %c0_65 = arith.constant 0 : index
    %189 = vector.load %arg7[%c0_63, %c0_64, %c0_65] : memref<2x8x32xf32, #tpu.memory_space<vmem>>, vector<2x8x32xf32>
    tpu.vector_store %arg7[%c0_63, %c0_64, %c0_65], %188 {strides = array<i32>} : memref<2x8x32xf32, #tpu.memory_space<vmem>>, vector<2x8x32xf32>,
    return
  }
  func.func @transform_0(%arg0: i32) -> (i32, i32, i32) {
    %c0_i32 = arith.constant 0 : i32
    %c0_i32_0 = arith.constant 0 : i32
    %c0_i32_1 = arith.constant 0 : i32
    %c0_i32_2 = arith.constant 0 : i32
    return %c0_i32, %c0_i32_0, %c0_i32_1 : i32, i32, i32
  }
  func.func @transform_1(%arg0: i32) -> (i32, i32) {
    %c0_i32 = arith.constant 0 : i32
    %c0_i32_0 = arith.constant 0 : i32
    %c0_i32_1 = arith.constant 0 : i32
    return %c0_i32, %c0_i32_0 : i32, i32
  }
  func.func @transform_2(%arg0: i32) -> (i32, i32, i32) {
    %c0_i32 = arith.constant 0 : i32
    %c0_i32_0 = arith.constant 0 : i32
    %c0_i32_1 = arith.constant 0 : i32
    %c0_i32_2 = arith.constant 0 : i32
    return %c0_i32, %c0_i32_0, %c0_i32_1 : i32, i32, i32
  }
  func.func @transform_3(%arg0: i32) -> (i32, i32) {
    %c0_i32 = arith.constant 0 : i32
    %c0_i32_0 = arith.constant 0 : i32
    %c0_i32_1 = arith.constant 0 : i32
    return %c0_i32, %c0_i32_0 : i32, i32
  }
  func.func @transform_4(%arg0: i32) -> (i32, i32) {
    %c0_i32 = arith.constant 0 : i32
    %c0_i32_0 = arith.constant 0 : i32
    %c0_i32_1 = arith.constant 0 : i32
    return %c0_i32, %c0_i32_0 : i32, i32
  }
  func.func @transform_5(%arg0: i32) -> (i32, i32) {
    %c0_i32 = arith.constant 0 : i32
    %c0_i32_0 = arith.constant 0 : i32
    %c0_i32_1 = arith.constant 0 : i32
    return %c0_i32, %c0_i32_0 : i32, i32
  }
  func.func @transform_6(%arg0: i32) -> (i32, i32, i32) {
    %c0_i32 = arith.constant 0 : i32
    %c0_i32_0 = arith.constant 0 : i32
    %c0_i32_1 = arith.constant 0 : i32
    %c0_i32_2 = arith.constant 0 : i32
    return %c0_i32, %c0_i32_0, %c0_i32_1 : i32, i32, i32
  }
}

</mosaic_0001>

<bundles_post_ra>
// kernel: encoder_layer.1
= control target key start
LH: loop header
LB: loop body
LE: loop exit
PB: predicated region body
PF: predicated region fallthrough
CT: control target
= control target key end

     0   :  { %11 = vsyncpa [#allocation3], 0  ;;  %s2181_s0 = inlined_call_operand.vmem [shape: f32[2,8,32], index: 0, kind: input, shape index: {}]   ;;  %s2182_s1 = inlined_call_operand.vmem [shape: bf16[32,96], index: 1, kind: input, shape index: {}]   ;;  %s2183_s2 = inlined_call_operand.vmem [shape: bf16[4,8,32], index: 2, kind: input, shape index: {}]   ;;  %s2184_s3 = inlined_call_operand.hbm [shape: bf16[32,64], index: 3, kind: input, shape index: {}]   ;;  %s2185_s4 = inlined_call_operand.vmem [shape: bf16[64,32], index: 4, kind: input, shape index: {}]   ;;  %s2186_s5 = inlined_call_operand.hbm [shape: f32[8,128], index: 5, kind: input, shape index: {}]   ;;  %s2187_s6 = inlined_call_operand.hbm [shape: f32[2,8,32], index: 6, kind: output, shape index: {}]  }
   0x1   :  { %12 = vsyncpa [#allocation6], 0 }
   0x2   :  { %13 = vsyncpa [#allocation4], 0  ;;  %s1854_s21 = smov [#allocation2]   ;;  %s1782_s25 = scalar_lea.hbm %s2184_s3, 256 }
   0x3   :  { %s25_s22 = sshll.u32 %s1854_s21, 4  ;;  %p1783_p0 = scmp.ne.s32.totalorder %s2184_s3, %s1782_s25  ;;  %s26_s22 = int_to_ptr.vmem [resolvable:$true] %s25_s22 }
   0x4   :  { %p1786_p1 = scmp.lt.u32.totalorder %s1782_s25, %s2184_s3 }
   0x6   :  { %p1788_p2 = pnand %p1786_p1, %p1783_p0 }
   0x8   :  { %1791 = shalt.err (!%p1788_p2)
}
   0x9   :  { %s1792_s30 = scalar_lea.vmem %s26_s22, 256  ;;  %p1797_p4 = scmp.lt.s32.totalorder %s26_s22, %s26_s22 }
   0xa   :  { %p1793_p3 = scmp.ne.s32.totalorder %s26_s22, %s1792_s30  ;;  %p1798_p5 = scmp.lt.s32.totalorder %s1792_s30, %s1792_s30 }
   0xc   :  { %p1799_p6 = por %p1798_p5, %p1797_p4 }
   0xe   :  { %p1800_p7 = pnand %p1799_p6, %p1793_p3 }
  0x10   :  { %1803 = shalt.err (!%p1800_p7)
}
  0x11   :  { %s1855_s7 = smov 64   ;;  %s1856_s8 = smov 4  }
  0x12   :  { %31 = dma.hbm_to_vmem [thread:$0]  %s2184_s3, 256, %s26_s22, [#allocation3], %s1855_s7, %s1855_s7, %s1856_s8  }
  0x13   :  { %s1857_s11 = smov [#allocation5]   ;;  %s1804_s15 = scalar_lea.hbm %s2186_s5, 128 }
  0x14   :  { %s40_s12 = sshll.u32 %s1857_s11, 4  ;;  %p1805_p8 = scmp.ne.s32.totalorder %s2186_s5, %s1804_s15  ;;  %s41_s12 = int_to_ptr.vmem [resolvable:$true] %s40_s12 }
  0x15   :  { %p1808_p9 = scmp.lt.u32.totalorder %s1804_s15, %s2186_s5 }
  0x17   :  { %p1810_p10 = pnand %p1808_p9, %p1805_p8 }
  0x19   :  { %1813 = shalt.err (!%p1810_p10)
}
  0x1a   :  { %s1814_s20 = scalar_lea.vmem %s41_s12, 128  ;;  %p1819_p12 = scmp.lt.s32.totalorder %s41_s12, %s41_s12 }
  0x1b   :  { %p1815_p11 = scmp.ne.s32.totalorder %s41_s12, %s1814_s20  ;;  %p1820_p13 = scmp.lt.s32.totalorder %s1814_s20, %s1814_s20 }
  0x1d   :  { %p1821_p0 = por %p1820_p13, %p1819_p12 }
  0x1f   :  { %p1822_p1 = pnand %p1821_p0, %p1815_p11 }
  0x21   :  { %1825 = shalt.err (!%p1822_p1)
}
  0x22   :  { %43 = dma.hbm_to_vmem [thread:$0]  %s2186_s5, 128, %s41_s12, [#allocation6]  }
  0x23   :  { %1848 = dma.done.wait [#allocation3], 256  }
  0x24   :  { %1849 = vsyncadd [#allocation3], 4294967040 }
  0x25   :  { %1850 = dma.done.wait [#allocation6], 128  }
  0x26   :  { %1851 = vsyncadd [#allocation6], 4294967168  ;;  %v1858_v0 = vmov 0.0   ;;  %vm1859_vm0 = vmmov 0   ;;  %v1734_v1 = vld [vmem:[%s2182_s1] sm:$0xff]   ;;  %v1735_v2 = vld [vmem:[%s2182_s1 + $0x8] sm:$0xff]  }
  0x27   :  { %1567 = vmatprep.subr.bf16.mxu1 %v1858_v0  ;;  %1571 = vmatprep.mubr.msk.bf16.mxu1 %vm1859_vm0, %v1858_v0  ;;  %v1949_v3 = vld [vmem:[%s2181_s0] sm:$0xff]  ;;  %v1954_v4 = vld [vmem:[%s2181_s0 + $0x8] sm:$0xff]  ;;  %vm75_vm1 = vcmask 261120   ;;  %v1470_v6 = vld [vmem:[#allocation5] ss:$0 sm:$0xff]  ;;  %s1860_s0 = smov 96  }
  0x28   :  { %1581 = vmatprep.subr.bf16.mxu0 %v1858_v0  ;;  %1583 = vmatprep.mubr.msk.bf16.mxu0 %vm1859_vm0, %v1858_v0  ;;  %v53_v5 = vpack.c.bf16 %v1954_v4, %v1949_v3  ;;  %vm128_vm2 = vcmask 64512   ;;  %s1861_s1 = smov 88   ;;  %vm252_vm3 = vcmask 1043456   ;;  %s1862_s29 = smov 120   ;;  %vm1363_vm4 = vcmask 523264  }
  0x29   :  { %1568 = vmatpush3.bf16.msra.mxu1 %v1734_v1  ;;  %s1863_s30 = smov 56   ;;  %s1865_s8 = smov 80  }
  0x2a   :  { %1569 = vmatprep.subr.bf16.mxu1 %v1858_v0  ;;  %s1866_s13 = smov 48   ;;  %s1867_s14 = smov 72  }
  0x2b   :  { %s1868_s15 = smov 104   ;;  %s1869_s18 = smov 40  }
  0x2d   :  { %1570 = vmatpush3.bf16.msra.mxu1 %v1735_v2 }
  0x2e   :  { %1575 = vmatprep.subr.bf16.mxu1 %v1858_v0 }
  0x30   :  { %1572 = vmatmul.mubr.msk.bf16.vlgmr.msra.gmra.mrb[0].mxu1 %vm75_vm1, %v53_v5 }
  0x31   :  { %1577 = vmatprep.mubr.msk.bf16.mxu1 %vm1859_vm0, %v1858_v0 }
 0x103   :  { %v113_v7 = vpop.f32.mrb[0].mxu1 }
 0x104   :  { %v114_v8 = vadd.f32 %v1470_v6, %v113_v7  ;;  %v1573_v9 = vpop.f32.mrb[1].mxu1 }
 0x105   :  { %v116_v10 = vpop.f32.mrb[2].mxu1 }
 0x106   :  { %v1963_v11 = vpack.c.bf16 %v114_v8, %v114_v8  ;;  %v117_v12 = vadd.f32 %v1470_v6, %v116_v10  ;;  %v1574_v13 = vpop.f32.mrb[3].mxu1 }
 0x108   :  { %126 = vrot.lane.b32.xlu0 %v1963_v11, %s1860_s0  ;;  %v1966_v14 = vpack.c.bf16 %v117_v12, %v117_v12 }
 0x10c   :  { %175 = vrot.lane.b32.xlu0 %v1966_v14, %s1860_s0 }
 0x17a   :  { %v127_v15 = vpop.permute.xlu0 %126 }
 0x17b   :  { %v133_v16 = vsel %vm128_vm2, %v127_v15, 0 }
 0x17c   :  { %1576 = vmatpush3.bf16.xpose.msra.mxu1 %v133_v16 }
 0x17d   :  { %1587 = vmatprep.subr.bf16.mxu1 %v1858_v0 }
 0x17e   :  { %v176_v17 = vpop.permute.xlu0 %175 }
 0x17f   :  { %v181_v18 = vsel %vm128_vm2, %v176_v17, 0 }
 0x180   :  { %1582 = vmatpush3.bf16.xpose.msra.mxu0 %v181_v18 }
 0x181   :  { %1593 = vmatprep.subr.bf16.mxu0 %v1858_v0 }
 0x183   :  { %1578 = vmatmul.mubr.msk.bf16.vlgmr.msra.gmra.mrb[4].mxu1 %vm128_vm2, %v1963_v11 }
 0x184   :  { %1589 = vmatprep.mubr.msk.bf16.mxu1 %vm1859_vm0, %v1858_v0 }
 0x187   :  { %1584 = vmatmul.mubr.msk.bf16.vlgmr.msra.gmra.mrb[0].mxu0 %vm128_vm2, %v1966_v14 }
 0x188   :  { %1595 = vmatprep.mubr.msk.bf16.mxu0 %vm1859_vm0, %v1858_v0 }
 0x256   :  { %v169_v19 = vpop.f32.mrb[4].mxu1 }
 0x257   :  { %v1579_v20 = vpop.f32.mrb[5].mxu1  ;;  %v223_v21 = vsel %vm128_vm2, %v169_v19, -inf }
 0x258   :  { %224 = vmax.xlane.f32.xlu1 %v223_v21  ;;  %v172_v22 = vpop.f32.mrb[6].mxu1 }
 0x259   :  { %v1580_v23 = vpop.f32.mrb[7].mxu1 }
 0x25a   :  { %v217_v24 = vpop.f32.mrb[0].mxu0 }
 0x25b   :  { %v1585_v25 = vpop.f32.mrb[1].mxu0  ;;  %v226_v26 = vsel %vm128_vm2, %v217_v24, -inf }
 0x25c   :  { %v220_v27 = vpop.f32.mrb[2].mxu0  ;;  %227 = vmax.xlane.f32.xlu1 %v226_v26 }
 0x25d   :  { %v1586_v28 = vpop.f32.mrb[3].mxu0 }
 0x26d   :  { %247 = vrot.lane.b32.xlu1 %v1963_v11, %s1855_s7 }
 0x271   :  { %296 = vrot.lane.b32.xlu1 %v1966_v14, %s1855_s7  ;;  %s1864_s7 = smov 112  }
 0x275   :  { %348 = vrot.lane.b32.xlu1 %v1963_v11, %s1861_s1 }
 0x2e5   :  { %v225_v29 = vpop.xlane.xlu1 %224 }
 0x2e6   :  { %v229_v30 = vsub.f32 %v169_v19, %v225_v29 }
 0x2e8   :  { %v231_v31 = vmul.f32 1.442695, %v229_v30 }
 0x2e9   :  { %v228_v32 = vpop.xlane.xlu1 %227 }
 0x2ea   :  { %1742 = vpow2.f32 %v231_v31  ;;  %v230_v33 = vsub.f32 %v217_v24, %v228_v32 }
 0x2ec   :  { %v233_v34 = vmul.f32 1.442695, %v230_v33 }
 0x2ed   :  { %v248_v35 = vpop.permute.xlu1 %247 }
 0x2ee   :  { %1744 = vpow2.f32 %v233_v34  ;;  %v254_v36 = vsel %vm252_vm3, %v248_v35, 0  ;;  %v1484_v34 = vld [vmem:[%s2183_s2 + $0x4] sm:$0xf] }
 0x2ef   :  { %1588 = vmatpush3.bf16.msra.mxu1 %v254_v36 }
 0x2f0   :  { %1599 = vmatprep.subr.bf16.mxu1 %v1858_v0 }
 0x2f1   :  { %v297_v37 = vpop.permute.xlu1 %296 }
 0x2f2   :  { %v302_v38 = vsel %vm252_vm3, %v297_v37, 0  ;;  %v573_v37 = vsel %vm252_vm3, %v1484_v34, 0 }
 0x2f3   :  { %1594 = vmatpush3.bf16.msra.mxu0 %v302_v38 }
 0x2f4   :  { %v1743_v39 = vpop.eup %1742  ;;  %1605 = vmatprep.subr.bf16.mxu0 %v1858_v0 }
 0x2f5   :  { %v235_v40 = vsel %vm128_vm2, %v1743_v39, 0.0  ;;  %v349_v43 = vpop.permute.xlu1 %348 }
 0x2f6   :  { %236 = vadd.xlane.f32.xlu0 %v235_v40  ;;  %v354_v50 = vsel %vm128_vm2, %v349_v43, 0 }
 0x2f8   :  { %v1745_v41 = vpop.eup %1744 }
 0x2f9   :  { %v238_v42 = vsel %vm128_vm2, %v1745_v41, 0.0 }
 0x2fa   :  { %239 = vadd.xlane.f32.xlu1 %v238_v42 }
 0x30b   :  { %398 = vrot.lane.b32.xlu1 %v1966_v14, %s1861_s1 }
 0x30c   :  { %346 = vrot.lane.b32.xlu0 %v1963_v11, %s1862_s29 }
 0x30f   :  { %396 = vrot.lane.b32.xlu1 %v1966_v14, %s1862_s29 }
 0x383   :  { %v237_v44 = vpop.xlane.xlu0 %236 }
 0x384   :  { %1746 = vrcp.f32 %v237_v44 }
 0x387   :  { %v240_v45 = vpop.xlane.xlu1 %239  ;;  %v347_v55 = vpop.permute.xlu0 %346 }
 0x388   :  { %1748 = vrcp.f32 %v240_v45 }
 0x38b   :  { %v399_v52 = vpop.permute.xlu1 %398 }
 0x38c   :  { %v404_v54 = vsel %vm128_vm2, %v399_v52, 0 }
 0x38e   :  { %v1747_v46 = vpop.eup %1746 }
 0x38f   :  { %v243_v47 = vmul.f32 %v1747_v46, %v1743_v39  ;;  %v397_v56 = vpop.permute.xlu1 %396  ;;  %v345_v39 = vld [vmem:[%s2183_s2] sm:$0xf] }
 0x390   :  { %v620_v42 = vsel %vm252_vm3, %v345_v39, 0 }
 0x391   :  { %v245_v48 = vpack.c.bf16 %v243_v47, %v243_v47 }
 0x392   :  { %v1749_v49 = vpop.eup %1748 }
 0x393   :  { %v244_v51 = vmul.f32 %v1749_v49, %v1745_v41  ;;  %1590 = vmatmul.mubr.msk.bf16.vlgmr.msra.gmra.mrb[8].mxu1 %vm128_vm2, %v245_v48 }
 0x394   :  { %1600 = vmatpush3.bf16.xpose.msra.mxu1 %v354_v50  ;;  %1601 = vmatprep.mubr.msk.bf16.mxu1 %vm1859_vm0, %v1858_v0 }
 0x395   :  { %v246_v53 = vpack.c.bf16 %v244_v51, %v244_v51  ;;  %1611 = vmatprep.subr.bf16.mxu1 %v1858_v0 }
 0x397   :  { %1596 = vmatmul.mubr.msk.bf16.vlgmr.msra.gmra.mrb[4].mxu0 %vm128_vm2, %v246_v53 }
 0x398   :  { %1606 = vmatpush3.bf16.xpose.msra.mxu0 %v404_v54  ;;  %1607 = vmatprep.mubr.msk.bf16.mxu0 %vm1859_vm0, %v1858_v0 }
 0x399   :  { %1617 = vmatprep.subr.bf16.mxu0 %v1858_v0 }
 0x39b   :  { %1602 = vmatmul.mubr.msk.bf16.vlgmr.msra.gmra.mrb[12].mxu1 %vm128_vm2, %v347_v55 }
 0x39c   :  { %1613 = vmatprep.mubr.msk.bf16.mxu1 %vm1859_vm0, %v1858_v0 }
 0x39f   :  { %1608 = vmatmul.mubr.msk.bf16.vlgmr.msra.gmra.mrb[8].mxu0 %vm128_vm2, %v397_v56 }
 0x3a0   :  { %1619 = vmatprep.mubr.msk.bf16.mxu0 %vm1859_vm0, %v1858_v0 }
 0x466   :  { %v2013_v57 = vpop.f32.mrb[8].mxu1 }
 0x467   :  { %v1591_v58 = vpop.f32.mrb[9].mxu1 }
 0x468   :  { %v293_v59 = vpop.f32.mrb[10].mxu1 }
 0x469   :  { %v1592_v60 = vpop.f32.mrb[11].mxu1 }
 0x46a   :  { %v2015_v61 = vpop.f32.mrb[4].mxu0 }
 0x46b   :  { %v344_v62 = vpack.c.bf16 %v2015_v61, %v2013_v57  ;;  %v1597_v63 = vpop.f32.mrb[5].mxu0 }
 0x46c   :  { %v341_v1 = vpop.f32.mrb[6].mxu0 }
 0x46d   :  { %v1598_v2 = vpop.f32.mrb[7].mxu0 }
 0x46e   :  { %v390_v5 = vpop.f32.mrb[12].mxu1 }
 0x46f   :  { %v1603_v6 = vpop.f32.mrb[13].mxu1  ;;  %v446_v7 = vsel %vm128_vm2, %v390_v5, -inf }
 0x470   :  { %447 = vmax.xlane.f32.xlu1 %v446_v7  ;;  %v393_v8 = vpop.f32.mrb[14].mxu1 }
 0x471   :  { %v1604_v9 = vpop.f32.mrb[15].mxu1 }
 0x472   :  { %v440_v10 = vpop.f32.mrb[8].mxu0 }
 0x473   :  { %v1609_v12 = vpop.f32.mrb[9].mxu0  ;;  %v449_v13 = vsel %vm128_vm2, %v440_v10, -inf }
 0x474   :  { %450 = vmax.xlane.f32.xlu0 %v449_v13  ;;  %v443_v15 = vpop.f32.mrb[10].mxu0 }
 0x475   :  { %v1610_v16 = vpop.f32.mrb[11].mxu0 }
 0x48a   :  { %518 = vrot.lane.b32.xlu0 %v1966_v14, %s1863_s30 }
 0x48e   :  { %663 = vrot.lane.b32.xlu0 %v1963_v11, %s1864_s7 }
 0x4fd   :  { %v448_v17 = vpop.xlane.xlu1 %447 }
 0x4fe   :  { %v452_v18 = vsub.f32 %v390_v5, %v448_v17 }
 0x500   :  { %v454_v19 = vmul.f32 1.442695, %v452_v18 }
 0x501   :  { %v451_v20 = vpop.xlane.xlu0 %450 }
 0x502   :  { %1750 = vpow2.f32 %v454_v19  ;;  %v453_v21 = vsub.f32 %v440_v10, %v451_v20 }
 0x504   :  { %v456_v22 = vmul.f32 1.442695, %v453_v21 }
 0x505   :  { %v519_v23 = vpop.permute.xlu0 %518 }
 0x506   :  { %1752 = vpow2.f32 %v456_v22  ;;  %v524_v24 = vsel %vm252_vm3, %v519_v23, 0 }
 0x507   :  { %1618 = vmatpush3.bf16.msra.mxu0 %v524_v24 }
 0x508   :  { %1629 = vmatprep.subr.bf16.mxu0 %v1858_v0 }
 0x509   :  { %v664_v59 = vpop.permute.xlu0 %663 }
 0x50c   :  { %v1751_v25 = vpop.eup %1750 }
 0x50d   :  { %v458_v26 = vsel %vm128_vm2, %v1751_v25, 0.0 }
 0x50e   :  { %459 = vadd.xlane.f32.xlu1 %v458_v26 }
 0x510   :  { %v1753_v27 = vpop.eup %1752 }
 0x511   :  { %v461_v28 = vsel %vm128_vm2, %v1753_v27, 0.0 }
 0x512   :  { %462 = vadd.xlane.f32.xlu1 %v461_v28 }
 0x523   :  { %470 = vrot.lane.b32.xlu1 %v1963_v11, %s1863_s30 }
 0x527   :  { %665 = vrot.lane.b32.xlu1 %v1963_v11, %s1865_s8 }
 0x52b   :  { %715 = vrot.lane.b32.xlu1 %v1966_v14, %s1865_s8 }
 0x52f   :  { %713 = vrot.lane.b32.xlu1 %v1966_v14, %s1864_s7 }
 0x59b   :  { %v460_v29 = vpop.xlane.xlu1 %459 }
 0x59c   :  { %1754 = vrcp.f32 %v460_v29 }
 0x59f   :  { %v463_v30 = vpop.xlane.xlu1 %462 }
 0x5a0   :  { %1756 = vrcp.f32 %v463_v30 }
 0x5a3   :  { %v471_v31 = vpop.permute.xlu1 %470 }
 0x5a4   :  { %v476_v32 = vsel %vm252_vm3, %v471_v31, 0 }
 0x5a5   :  { %1612 = vmatpush3.bf16.msra.mxu1 %v476_v32 }
 0x5a6   :  { %v1755_v33 = vpop.eup %1754  ;;  %1623 = vmatprep.subr.bf16.mxu1 %v1858_v0 }
 0x5a7   :  { %v466_v35 = vmul.f32 %v1755_v33, %v1751_v25  ;;  %v666_v43 = vpop.permute.xlu1 %665 }
 0x5a8   :  { %v671_v55 = vsel %vm128_vm2, %v666_v43, 0 }
 0x5a9   :  { %v468_v36 = vpack.c.bf16 %v466_v35, %v466_v35 }
 0x5aa   :  { %v1757_v38 = vpop.eup %1756 }
 0x5ab   :  { %v467_v40 = vmul.f32 %v1757_v38, %v1753_v27  ;;  %1614 = vmatmul.mubr.msk.bf16.vlgmr.msra.gmra.mrb[16].mxu1 %vm128_vm2, %v468_v36  ;;  %v716_v44 = vpop.permute.xlu1 %715 }
 0x5ac   :  { %1624 = vmatpush3.bf16.msra.mxu1 %v573_v37  ;;  %1625 = vmatprep.mubr.msk.bf16.mxu1 %vm1859_vm0, %v1858_v0  ;;  %v721_v45 = vsel %vm128_vm2, %v716_v44, 0  ;;  %v1491_v44 = vld [vmem:[%s2183_s2 + $0x8] sm:$0xf] }
 0x5ad   :  { %v469_v41 = vpack.c.bf16 %v467_v40, %v467_v40  ;;  %1635 = vmatprep.subr.bf16.mxu1 %v1858_v0 }
 0x5af   :  { %1620 = vmatmul.mubr.msk.bf16.vlgmr.msra.gmra.mrb[12].mxu0 %vm128_vm2, %v469_v41  ;;  %v714_v46 = vpop.permute.xlu1 %713 }
 0x5b0   :  { %1630 = vmatpush3.bf16.msra.mxu0 %v620_v42  ;;  %1631 = vmatprep.mubr.msk.bf16.mxu0 %vm1859_vm0, %v1858_v0 }
 0x5b1   :  { %1641 = vmatprep.subr.bf16.mxu0 %v1858_v0 }
 0x5b7   :  { %1632 = vmatmul.mubr.msk.bf16.vlgmr.msra.gmra.mrb[16].mxu0 %vm128_vm2, %v344_v62 }
 0x5b8   :  { %1643 = vmatprep.mubr.msk.bf16.mxu0 %vm1859_vm0, %v1858_v0 }
 0x5b9   :  { %1642 = vmatpush3.bf16.xpose.msra.mxu0 %v721_v45  ;;  %v890_v45 = vsel %vm252_vm3, %v1491_v44, 0 }
 0x5ba   :  { %1653 = vmatprep.subr.bf16.mxu0 %v1858_v0 }
 0x5c0   :  { %1644 = vmatmul.mubr.msk.bf16.vlgmr.msra.gmra.mrb[20].mxu0 %vm128_vm2, %v714_v46 }
 0x5c1   :  { %1655 = vmatprep.mubr.msk.bf16.mxu0 %vm1859_vm0, %v1858_v0 }
 0x67e   :  { %v512_v47 = vpop.f32.mrb[16].mxu1 }
 0x67f   :  { %v1615_v48 = vpop.f32.mrb[17].mxu1 }
 0x680   :  { %v515_v49 = vpop.f32.mrb[18].mxu1 }
 0x681   :  { %v1616_v50 = vpop.f32.mrb[19].mxu1 }
 0x682   :  { %v560_v51 = vpop.f32.mrb[12].mxu0 }
 0x683   :  { %v566_v52 = vpack.c.bf16 %v560_v51, %v512_v47  ;;  %v1621_v53 = vpop.f32.mrb[13].mxu0 }
 0x684   :  { %v563_v54 = vpop.f32.mrb[14].mxu0 }
 0x685   :  { %v1622_v56 = vpop.f32.mrb[15].mxu0  ;;  %1626 = vmatmul.mubr.msk.bf16.vlgmr.msra.gmra.mrb[20].mxu1 %vm128_vm2, %v566_v52 }
 0x686   :  { %1636 = vmatpush3.bf16.xpose.msra.mxu1 %v671_v55  ;;  %1637 = vmatprep.mubr.msk.bf16.mxu1 %vm1859_vm0, %v1858_v0 }
 0x687   :  { %1647 = vmatprep.subr.bf16.mxu1 %v1858_v0 }
 0x68a   :  { %v656_v57 = vpop.f32.mrb[16].mxu0 }
 0x68b   :  { %v1633_v58 = vpop.f32.mrb[17].mxu0 }
 0x68c   :  { %v659_v60 = vpop.f32.mrb[18].mxu0 }
 0x68d   :  { %v1634_v61 = vpop.f32.mrb[19].mxu0  ;;  %1638 = vmatmul.mubr.msk.bf16.vlgmr.msra.gmra.mrb[24].mxu1 %vm128_vm2, %v664_v59 }
 0x68e   :  { %1649 = vmatprep.mubr.msk.bf16.mxu1 %vm1859_vm0, %v1858_v0 }
 0x693   :  { %v757_v62 = vpop.f32.mrb[20].mxu0 }
 0x694   :  { %v1645_v63 = vpop.f32.mrb[21].mxu0  ;;  %v766_v1 = vsel %vm128_vm2, %v757_v62, -inf }
 0x695   :  { %767 = vmax.xlane.f32.xlu1 %v766_v1  ;;  %v760_v2 = vpop.f32.mrb[22].mxu0 }
 0x696   :  { %v1646_v5 = vpop.f32.mrb[23].mxu0 }
 0x6a6   :  { %787 = vrot.lane.b32.xlu1 %v1963_v11, %s1866_s13 }
 0x6aa   :  { %937 = vrot.lane.b32.xlu1 %v1963_v11, %s1867_s14 }
 0x6ae   :  { %987 = vrot.lane.b32.xlu1 %v1966_v14, %s1867_s14 }
 0x6b2   :  { %985 = vrot.lane.b32.xlu1 %v1966_v14, %s1868_s15 }
 0x722   :  { %v768_v6 = vpop.xlane.xlu1 %767 }
 0x723   :  { %v770_v9 = vsub.f32 %v757_v62, %v768_v6 }
 0x725   :  { %v773_v10 = vmul.f32 1.442695, %v770_v9 }
 0x726   :  { %v788_v7 = vpop.permute.xlu1 %787 }
 0x727   :  { %v793_v8 = vsel %vm252_vm3, %v788_v7, 0  ;;  %1758 = vpow2.f32 %v773_v10 }
 0x728   :  { %1648 = vmatpush3.bf16.msra.mxu1 %v793_v8 }
 0x729   :  { %1659 = vmatprep.subr.bf16.mxu1 %v1858_v0 }
 0x72a   :  { %v938_v39 = vpop.permute.xlu1 %937 }
 0x72b   :  { %v943_v41 = vsel %vm128_vm2, %v938_v39, 0 }
 0x72e   :  { %v988_v50 = vpop.permute.xlu1 %987 }
 0x72f   :  { %v993_v55 = vsel %vm128_vm2, %v988_v50, 0 }
 0x731   :  { %v1759_v22 = vpop.eup %1758 }
 0x732   :  { %v778_v25 = vsel %vm128_vm2, %v1759_v22, 0.0  ;;  %v986_v62 = vpop.permute.xlu1 %985 }
 0x758   :  { %v609_v12 = vpop.f32.mrb[20].mxu1 }
 0x759   :  { %v2077_v13 = vadd.f32 %v656_v57, %v609_v12  ;;  %v1627_v15 = vpop.f32.mrb[21].mxu1 }
 0x75a   :  { %v612_v16 = vpop.f32.mrb[22].mxu1 }
 0x75b   :  { %v2079_v17 = vadd.f32 %v659_v60, %v612_v16  ;;  %v1628_v18 = vpop.f32.mrb[23].mxu1 }
 0x760   :  { %v707_v19 = vpop.f32.mrb[24].mxu1 }
 0x761   :  { %v1639_v20 = vpop.f32.mrb[25].mxu1  ;;  %v763_v21 = vsel %vm128_vm2, %v707_v19, -inf }
 0x762   :  { %764 = vmax.xlane.f32.xlu0 %v763_v21  ;;  %v710_v23 = vpop.f32.mrb[26].mxu1 }
 0x763   :  { %v1640_v24 = vpop.f32.mrb[27].mxu1 }
 0x766   :  { %779 = vadd.xlane.f32.xlu0 %v778_v25 }
 0x7ef   :  { %v765_v26 = vpop.xlane.xlu0 %764 }
 0x7f0   :  { %v769_v27 = vsub.f32 %v707_v19, %v765_v26 }
 0x7f2   :  { %v771_v28 = vmul.f32 1.442695, %v769_v27 }
 0x7f3   :  { %v780_v31 = vpop.xlane.xlu0 %779 }
 0x7f4   :  { %1760 = vpow2.f32 %v771_v28 }
 0x7f5   :  { %1762 = vrcp.f32 %v780_v31 }
 0x7fe   :  { %v1761_v29 = vpop.eup %1760 }
 0x7ff   :  { %v775_v30 = vsel %vm128_vm2, %v1761_v29, 0.0  ;;  %v1763_v32 = vpop.eup %1762 }
 0x800   :  { %776 = vadd.xlane.f32.xlu0 %v775_v30  ;;  %v784_v34 = vmul.f32 %v1763_v32, %v1759_v22  ;;  %v1497_v30 = vld [vmem:[%s2183_s2 + $0xc] sm:$0xf] }
 0x801   :  { %v1162_v31 = vsel %vm252_vm3, %v1497_v30, 0  ;;  %v1502_v30 = vld [vmem:[#allocation5 + $0x2] ss:$0 sm:$0xff] }
 0x802   :  { %v786_v37 = vpack.c.bf16 %v784_v34, %v784_v34 }
 0x816   :  { %835 = vrot.lane.b32.xlu0 %v1966_v14, %s1866_s13 }
 0x81a   :  { %935 = vrot.lane.b32.xlu0 %v1963_v11, %s1868_s15 }
 0x88d   :  { %v777_v33 = vpop.xlane.xlu0 %776 }
 0x88e   :  { %1764 = vrcp.f32 %v777_v33 }
 0x891   :  { %v836_v35 = vpop.permute.xlu0 %835 }
 0x892   :  { %v841_v36 = vsel %vm252_vm3, %v836_v35, 0 }
 0x893   :  { %1654 = vmatpush3.bf16.msra.mxu0 %v841_v36 }
 0x894   :  { %1665 = vmatprep.subr.bf16.mxu0 %v1858_v0 }
 0x895   :  { %v936_v43 = vpop.permute.xlu0 %935 }
 0x896   :  { %1656 = vmatmul.mubr.msk.bf16.vlgmr.msra.gmra.mrb[24].mxu0 %vm128_vm2, %v786_v37 }
 0x897   :  { %1667 = vmatprep.mubr.msk.bf16.mxu0 %vm1859_vm0, %v1858_v0 }
 0x898   :  { %v1765_v38 = vpop.eup %1764 }
 0x899   :  { %v783_v40 = vmul.f32 %v1765_v38, %v1761_v29 }
 0x89b   :  { %v785_v42 = vpack.c.bf16 %v783_v40, %v783_v40 }
 0x89c   :  { %1666 = vmatpush3.bf16.xpose.msra.mxu0 %v943_v41 }
 0x89d   :  { %1650 = vmatmul.mubr.msk.bf16.vlgmr.msra.gmra.mrb[28].mxu1 %vm128_vm2, %v785_v42  ;;  %1677 = vmatprep.subr.bf16.mxu0 %v1858_v0 }
 0x89e   :  { %1661 = vmatprep.mubr.msk.bf16.mxu1 %vm1859_vm0, %v1858_v0  ;;  %1660 = vmatpush3.bf16.msra.mxu1 %v890_v45 }
 0x89f   :  { %1671 = vmatprep.subr.bf16.mxu1 %v1858_v0 }
 0x8a3   :  { %1668 = vmatmul.mubr.msk.bf16.vlgmr.msra.gmra.mrb[28].mxu0 %vm128_vm2, %v936_v43 }
 0x8a4   :  { %1679 = vmatprep.mubr.msk.bf16.mxu0 %vm1859_vm0, %v1858_v0 }
 0x969   :  { %v877_v46 = vpop.f32.mrb[24].mxu0 }
 0x96a   :  { %v1657_v47 = vpop.f32.mrb[25].mxu0 }
 0x96b   :  { %v880_v48 = vpop.f32.mrb[26].mxu0  ;;  %v1499_v47 = vld [vmem:[#allocation5 + $0x1] ss:$0 sm:$0xff] }
 0x96c   :  { %v1658_v49 = vpop.f32.mrb[27].mxu0 }
 0x970   :  { %v829_v51 = vpop.f32.mrb[28].mxu1 }
 0x971   :  { %v883_v52 = vpack.c.bf16 %v877_v46, %v829_v51  ;;  %v1651_v53 = vpop.f32.mrb[29].mxu1 }
 0x972   :  { %v832_v54 = vpop.f32.mrb[30].mxu1 }
 0x973   :  { %v1652_v56 = vpop.f32.mrb[31].mxu1  ;;  %1662 = vmatmul.mubr.msk.bf16.vlgmr.msra.gmra.mrb[32].mxu1 %vm128_vm2, %v883_v52 }
 0x974   :  { %1672 = vmatpush3.bf16.xpose.msra.mxu1 %v993_v55  ;;  %1673 = vmatprep.mubr.msk.bf16.mxu1 %vm1859_vm0, %v1858_v0 }
 0x975   :  { %1683 = vmatprep.subr.bf16.mxu1 %v1858_v0 }
 0x976   :  { %v979_v57 = vpop.f32.mrb[28].mxu0 }
 0x977   :  { %v1669_v58 = vpop.f32.mrb[29].mxu0  ;;  %v1035_v59 = vsel %vm128_vm2, %v979_v57, -inf }
 0x978   :  { %1036 = vmax.xlane.f32.xlu0 %v1035_v59  ;;  %v982_v60 = vpop.f32.mrb[30].mxu0 }
 0x979   :  { %v1670_v61 = vpop.f32.mrb[31].mxu0 }
 0x97b   :  { %1674 = vmatmul.mubr.msk.bf16.vlgmr.msra.gmra.mrb[36].mxu1 %vm128_vm2, %v986_v62 }
 0x97c   :  { %1685 = vmatprep.mubr.msk.bf16.mxu1 %vm1859_vm0, %v1858_v0 }
 0xa05   :  { %v1037_v63 = vpop.xlane.xlu0 %1036 }
 0xa06   :  { %v1041_v1 = vsub.f32 %v979_v57, %v1037_v63 }
 0xa08   :  { %v1043_v2 = vmul.f32 1.442695, %v1041_v1 }
 0xa0a   :  { %1766 = vpow2.f32 %v1043_v2 }
 0xa14   :  { %v1767_v5 = vpop.eup %1766 }
 0xa15   :  { %v1047_v6 = vsel %vm128_vm2, %v1767_v5, 0.0 }
 0xa16   :  { %1048 = vadd.xlane.f32.xlu0 %v1047_v6 }
 0xa46   :  { %v926_v7 = vpop.f32.mrb[32].mxu1 }
 0xa47   :  { %v933_v8 = vadd.f32 %v926_v7, %v2077_v13  ;;  %v1663_v9 = vpop.f32.mrb[33].mxu1  ;;  %v1736_v7 = vld [vmem:[#allocation2] sm:$0xff]  }
 0xa48   :  { %v929_v10 = vpop.f32.mrb[34].mxu1  ;;  %v1739_v9 = vld [vmem:[%s2185_s4 + $0x8] sm:$0xff]  }
 0xa49   :  { %v934_v12 = vadd.f32 %v929_v10, %v2079_v17  ;;  %v1664_v15 = vpop.f32.mrb[35].mxu1 }
 0xa4e   :  { %v1029_v16 = vpop.f32.mrb[36].mxu1 }
 0xa4f   :  { %v1675_v18 = vpop.f32.mrb[37].mxu1  ;;  %v1038_v19 = vsel %vm128_vm2, %v1029_v16, -inf }
 0xa50   :  { %1039 = vmax.xlane.f32.xlu1 %v1038_v19  ;;  %v1032_v20 = vpop.f32.mrb[38].mxu1 }
 0xa51   :  { %v1676_v21 = vpop.f32.mrb[39].mxu1 }
 0xa52   :  { %v1500_v21 = vld [vmem:[#allocation5 + $0x4] ss:$0 sm:$0xff] }
 0xa61   :  { %1059 = vrot.lane.b32.xlu1 %v1963_v11, %s1869_s18 }
 0xaa3   :  { %v1049_v22 = vpop.xlane.xlu0 %1048 }
 0xaa4   :  { %1768 = vrcp.f32 %v1049_v22 }
 0xaae   :  { %v1769_v23 = vpop.eup %1768 }
 0xaaf   :  { %v1055_v25 = vmul.f32 %v1769_v23, %v1767_v5 }
 0xab1   :  { %v1057_v28 = vpack.c.bf16 %v1055_v25, %v1055_v25  ;;  %v1501_v25 = vld [vmem:[#allocation5 + $0x5] ss:$0 sm:$0xff] }
 0xadd   :  { %v1040_v24 = vpop.xlane.xlu1 %1039 }
 0xade   :  { %v1042_v13 = vsub.f32 %v1029_v16, %v1040_v24 }
 0xae0   :  { %v1045_v26 = vmul.f32 1.442695, %v1042_v13 }
 0xae1   :  { %v1060_v27 = vpop.permute.xlu1 %1059 }
 0xae2   :  { %1770 = vpow2.f32 %v1045_v26  ;;  %v1065_v17 = vsel %vm252_vm3, %v1060_v27, 0 }
 0xae3   :  { %1678 = vmatpush3.bf16.msra.mxu0 %v1065_v17 }
 0xae4   :  { %1689 = vmatprep.subr.bf16.mxu0 %v1858_v0 }
 0xae6   :  { %1680 = vmatmul.mubr.msk.bf16.vlgmr.msra.gmra.mrb[32].mxu0 %vm128_vm2, %v1057_v28 }
 0xae7   :  { %1691 = vmatprep.mubr.msk.bf16.mxu0 %vm1859_vm0, %v1858_v0  ;;  %1690 = vmatpush3.bf16.msra.mxu0 %v1162_v31 }
 0xae8   :  { %1703 = vmatprep.subr.bf16.mxu0 %v1858_v0 }
 0xaec   :  { %v1771_v11 = vpop.eup %1770 }
 0xaed   :  { %v1050_v29 = vsel %vm128_vm2, %v1771_v11, 0.0 }
 0xaee   :  { %1051 = vadd.xlane.f32.xlu0 %v1050_v29  ;;  %v1741_v29 = vld [vmem:[%s2185_s4 + $0x18] sm:$0xff]  }
 0xb04   :  { %1107 = vrot.lane.b32.xlu0 %v1966_v14, %s1869_s18 }
 0xb7b   :  { %v1052_v32 = vpop.xlane.xlu0 %1051 }
 0xb7c   :  { %1772 = vrcp.f32 %v1052_v32 }
 0xb7f   :  { %v1108_v33 = vpop.permute.xlu0 %1107 }
 0xb80   :  { %v1113_v34 = vsel %vm252_vm3, %v1108_v33, 0 }
 0xb81   :  { %1684 = vmatpush3.bf16.msra.mxu1 %v1113_v34 }
 0xb82   :  { %1695 = vmatprep.subr.bf16.mxu1 %v1858_v0 }
 0xb86   :  { %v1773_v35 = vpop.eup %1772 }
 0xb87   :  { %v1056_v36 = vmul.f32 %v1773_v35, %v1771_v11  ;;  %v1740_v11 = vld [vmem:[%s2185_s4 + $0x10] sm:$0xff]  }
 0xb89   :  { %v1058_v14 = vpack.c.bf16 %v1056_v36, %v1056_v36 }
 0xb8b   :  { %1686 = vmatmul.mubr.msk.bf16.vlgmr.msra.gmra.mrb[40].mxu1 %vm128_vm2, %v1058_v14 }
 0xb8c   :  { %1699 = vmatprep.mubr.msk.bf16.mxu1 %vm1859_vm0, %v1858_v0  ;;  %1696 = vmatpush3.bf16.msra.mxu1 %v1736_v7  ;;  %v1513_v7 = vld [vmem:[#allocation5 + $0x7] ss:$0 sm:$0xff] }
 0xb8d   :  { %1697 = vmatprep.subr.bf16.mxu1 %v1858_v0 }
 0xbb9   :  { %v1101_v37 = vpop.f32.mrb[32].mxu0 }
 0xbba   :  { %v1681_v38 = vpop.f32.mrb[33].mxu0 }
 0xbbb   :  { %v1104_v39 = vpop.f32.mrb[34].mxu0 }
 0xbbc   :  { %v1682_v40 = vpop.f32.mrb[35].mxu0  ;;  %v1506_v39 = vld [vmem:[#allocation5 + $0x3] ss:$0 sm:$0xff] }
 0xc5e   :  { %v1149_v41 = vpop.f32.mrb[40].mxu1 }
 0xc5f   :  { %v1155_v42 = vpack.c.bf16 %v1149_v41, %v1101_v37  ;;  %v1687_v43 = vpop.f32.mrb[41].mxu1 }
 0xc60   :  { %v1152_v44 = vpop.f32.mrb[42].mxu1 }
 0xc61   :  { %v1688_v45 = vpop.f32.mrb[43].mxu1  ;;  %1692 = vmatmul.mubr.msk.bf16.vlgmr.msra.gmra.mrb[36].mxu0 %vm128_vm2, %v1155_v42 }
 0xc62   :  { %1711 = vmatprep.mubr.msk.bf16.mxu0 %vm1859_vm0, %v1858_v0 }
 0xd34   :  { %v1198_v46 = vpop.f32.mrb[36].mxu0 }
 0xd35   :  { %v1205_v48 = vadd.f32 %v1198_v46, %v933_v8  ;;  %v1693_v49 = vpop.f32.mrb[37].mxu0  ;;  %v1738_v8 = vld [vmem:[%s2185_s4] sm:$0xff]   ;;  %s1870_s4 = smov [#allocation7]  }
 0xd36   :  { %v1201_v50 = vpop.f32.mrb[38].mxu0  ;;  %1704 = vmatpush3.bf16.msra.mxu0 %v1738_v8  ;;  %s1457_s26 = sshll.u32 %s1870_s4, 4  ;;  %s1458_s26 = int_to_ptr.vmem [resolvable:$true] %s1457_s26 }
 0xd37   :  { %v1212_v51 = vadd.f32 %v1499_v47, %v1205_v48  ;;  %v1206_v52 = vadd.f32 %v1201_v50, %v934_v12  ;;  %v1694_v53 = vpop.f32.mrb[39].mxu0  ;;  %1705 = vmatprep.subr.bf16.mxu0 %v1858_v0  ;;  %s1826_s27 = scalar_lea.vmem %s1458_s26, 256  ;;  %p1831_p3 = scmp.lt.s32.totalorder %s1458_s26, %s1458_s26 }
 0xd38   :  { %p1827_p2 = scmp.ne.s32.totalorder %s1458_s26, %s1826_s27  ;;  %p1832_p4 = scmp.lt.s32.totalorder %s1826_s27, %s1826_s27 }
 0xd39   :  { %v1213_v54 = vadd.f32 %v1499_v47, %v1206_v52  ;;  %v1214_v55 = vadd.f32 %v1212_v51, %v1949_v3 }
 0xd3a   :  { %1706 = vmatpush3.bf16.msra.mxu0 %v1739_v9  ;;  %p1833_p5 = por %p1832_p4, %p1831_p3 }
 0xd3b   :  { %v1218_v56 = vsel %vm75_vm1, %v1214_v55, 0.0  ;;  %v1215_v57 = vadd.f32 %v1213_v54, %v1954_v4  ;;  %v1737_v4 = vld [vmem:[#allocation2 + $0x8] sm:$0xff]   ;;  %1707 = vmatprep.subr.bf16.mxu0 %v1858_v0 }
 0xd3c   :  { %1219 = vadd.xlane.f32.xlu1 %v1218_v56  ;;  %1698 = vmatpush3.bf16.msra.mxu1 %v1737_v4  ;;  %p1834_p6 = pnand %p1833_p5, %p1827_p2 }
 0xd3d   :  { %v1221_v58 = vsel %vm75_vm1, %v1215_v57, 0.0 }
 0xd3e   :  { %1222 = vadd.xlane.f32.xlu0 %v1221_v58  ;;  %1708 = vmatpush3.bf16.msra.mxu0 %v1740_v11 }
 0xd3f   :  { %1709 = vmatprep.subr.bf16.mxu0 %v1858_v0 }
 0xd42   :  { %1710 = vmatpush3.bf16.msra.mxu0 %v1741_v29 }
 0xdc9   :  { %v1220_v59 = vpop.xlane.xlu1 %1219 }
 0xdca   :  { %v1225_v60 = vmul.f32 0.03125, %v1220_v59 }
 0xdcb   :  { %v1223_v61 = vpop.xlane.xlu0 %1222 }
 0xdcc   :  { %v1227_v62 = vsub.f32 %v1214_v55, %v1225_v60  ;;  %v1226_v63 = vmul.f32 0.03125, %v1223_v61 }
 0xdce   :  { %v1228_v1 = vsub.f32 %v1215_v57, %v1226_v63  ;;  %v1229_v2 = vmul.f32 %v1227_v62, %v1227_v62 }
 0xdd0   :  { %v1231_v5 = vsel %vm75_vm1, %v1229_v2, 0.0  ;;  %v1230_v6 = vmul.f32 %v1228_v1, %v1228_v1 }
 0xdd1   :  { %1232 = vadd.xlane.f32.xlu1 %v1231_v5  ;;  %v1512_v5 = vld [vmem:[#allocation5 + $0x6] ss:$0 sm:$0xff] }
 0xdd2   :  { %v1234_v3 = vsel %vm75_vm1, %v1230_v6, 0.0 }
 0xdd3   :  { %1235 = vadd.xlane.f32.xlu0 %v1234_v3 }
 0xe5e   :  { %v1233_v10 = vpop.xlane.xlu1 %1232 }
 0xe5f   :  { %v1237_v12 = vmul.f32 0.03125, %v1233_v10 }
 0xe60   :  { %v1236_v15 = vpop.xlane.xlu0 %1235 }
 0xe61   :  { %v1239_v16 = vadd.f32 1e-05, %v1237_v12  ;;  %v1238_v18 = vmul.f32 0.03125, %v1236_v15 }
 0xe63   :  { %1774 = vrsqrt.f32 %v1239_v16  ;;  %v1240_v19 = vadd.f32 1e-05, %v1238_v18 }
 0xe65   :  { %1776 = vrsqrt.f32 %v1240_v19 }
 0xe6d   :  { %v1775_v20 = vpop.eup %1774 }
 0xe6e   :  { %v1243_v22 = vmul.f32 %v1775_v20, %v1227_v62 }
 0xe6f   :  { %v1777_v23 = vpop.eup %1776 }
 0xe70   :  { %v1249_v24 = vmul.f32 %v1500_v21, %v1243_v22  ;;  %v1244_v13 = vmul.f32 %v1777_v23, %v1228_v1 }
 0xe72   :  { %v1250_v26 = vmul.f32 %v1500_v21, %v1244_v13  ;;  %v1255_v27 = vadd.f32 %v1501_v25, %v1249_v24 }
 0xe74   :  { %v1256_v17 = vadd.f32 %v1501_v25, %v1250_v26 }
 0xe76   :  { %v1257_v28 = vpack.c.bf16 %v1256_v17, %v1255_v27 }
 0xe78   :  { %1700 = vmatmul.mubr.msk.bf16.vlgmr.msra.gmra.mrb[44].mxu1 %vm75_vm1, %v1257_v28 }
 0xf4b   :  { %v1316_v31 = vpop.f32.mrb[44].mxu1 }
 0xf4c   :  { %v1317_v32 = vadd.f32 %v1502_v30, %v1316_v31  ;;  %v1701_v33 = vpop.f32.mrb[45].mxu1 }
 0xf4d   :  { %v1319_v34 = vpop.f32.mrb[46].mxu1 }
 0xf4e   :  { %v1320_v35 = vadd.f32 %v1502_v30, %v1319_v34  ;;  %v1702_v36 = vpop.f32.mrb[47].mxu1  ;;  %v1323_v14 = vmax.f32 %v1317_v32, 0.0 }
 0xf50   :  { %v1324_v37 = vmax.f32 %v1320_v35, 0.0 }
 0xf52   :  { %v1325_v38 = vpack.c.bf16 %v1324_v37, %v1323_v14 }
 0xf54   :  { %1712 = vmatmul.mubr.msk.bf16.vlgmr.msra.gmra.mrb[40].mxu0 %vm1363_vm4, %v1325_v38 }
0x1027   :  { %v1401_v40 = vpop.f32.mrb[40].mxu0 }
0x1028   :  { %v1402_v0 = vadd.f32 %v1506_v39, %v1401_v40  ;;  %v1713_v41 = vpop.f32.mrb[41].mxu0 }
0x1029   :  { %v1404_v42 = vpop.f32.mrb[42].mxu0 }
0x102a   :  { %v1405_v43 = vadd.f32 %v1506_v39, %v1404_v42  ;;  %v1714_v44 = vpop.f32.mrb[43].mxu0  ;;  %v1408_v45 = vadd.f32 %v1402_v0, %v1255_v27 }
0x102c   :  { %v1412_v46 = vsel %vm75_vm1, %v1408_v45, 0.0  ;;  %v1409_v47 = vadd.f32 %v1405_v43, %v1256_v17 }
0x102d   :  { %1413 = vadd.xlane.f32.xlu1 %v1412_v46 }
0x102e   :  { %v1415_v48 = vsel %vm75_vm1, %v1409_v47, 0.0 }
0x102f   :  { %1416 = vadd.xlane.f32.xlu0 %v1415_v48 }
0x10ba   :  { %v1414_v49 = vpop.xlane.xlu1 %1413 }
0x10bb   :  { %v1418_v50 = vmul.f32 0.03125, %v1414_v49 }
0x10bc   :  { %v1417_v51 = vpop.xlane.xlu0 %1416 }
0x10bd   :  { %v1420_v52 = vsub.f32 %v1408_v45, %v1418_v50  ;;  %v1419_v53 = vmul.f32 0.03125, %v1417_v51 }
0x10bf   :  { %v1421_v54 = vsub.f32 %v1409_v47, %v1419_v53  ;;  %v1422_v55 = vmul.f32 %v1420_v52, %v1420_v52 }
0x10c1   :  { %v1424_v56 = vsel %vm75_vm1, %v1422_v55, 0.0  ;;  %v1423_v57 = vmul.f32 %v1421_v54, %v1421_v54 }
0x10c2   :  { %1425 = vadd.xlane.f32.xlu1 %v1424_v56 }
0x10c3   :  { %v1427_v58 = vsel %vm75_vm1, %v1423_v57, 0.0 }
0x10c4   :  { %1428 = vadd.xlane.f32.xlu0 %v1427_v58 }
0x114f   :  { %v1426_v59 = vpop.xlane.xlu1 %1425 }
0x1150   :  { %v1430_v60 = vmul.f32 0.03125, %v1426_v59 }
0x1151   :  { %v1429_v61 = vpop.xlane.xlu0 %1428 }
0x1152   :  { %v1432_v62 = vadd.f32 1e-05, %v1430_v60  ;;  %v1431_v63 = vmul.f32 0.03125, %v1429_v61 }
0x1154   :  { %1778 = vrsqrt.f32 %v1432_v62  ;;  %v1433_v1 = vadd.f32 1e-05, %v1431_v63 }
0x1156   :  { %1780 = vrsqrt.f32 %v1433_v1 }
0x115e   :  { %v1779_v2 = vpop.eup %1778 }
0x115f   :  { %v1436_v6 = vmul.f32 %v1779_v2, %v1420_v52 }
0x1160   :  { %v1781_v3 = vpop.eup %1780 }
0x1161   :  { %v1442_v4 = vmul.f32 %v1512_v5, %v1436_v6  ;;  %v1437_v8 = vmul.f32 %v1781_v3, %v1421_v54 }
0x1163   :  { %v1443_v9 = vmul.f32 %v1512_v5, %v1437_v8  ;;  %v1448_v10 = vadd.f32 %v1513_v7, %v1442_v4 }
0x1165   :  { %v1449_v12 = vadd.f32 %v1513_v7, %v1443_v9  ;;  %1450 = vst.msk [vmem:[#allocation7] sm:$0xff] %vm75_vm1, %v1448_v10 }
0x1167   :  { %1451 = vst.msk [vmem:[#allocation7 + $0x8] sm:$0xff] %vm75_vm1, %v1449_v12 }
0x1168   :  { %1837 = shalt.err (!%p1834_p6)
}
0x1169   :  { %s1838_s1 = scalar_lea.hbm %s2187_s6, 256 }
0x116a   :  { %p1839_p7 = scmp.ne.s32.totalorder %s2187_s6, %s1838_s1  ;;  %p1842_p8 = scmp.lt.u32.totalorder %s1838_s1, %s2187_s6 }
0x116c   :  { %p1844_p9 = pnand %p1842_p8, %p1839_p7 }
0x116e   :  { %1847 = shalt.err (!%p1844_p9)
}
0x116f   :  { %s1871_s9 = smov 128   ;;  %s1872_s10 = smov 8  }
0x1170   :  { %1463 = dma.vmem_to_hbm [thread:$0]  %s1458_s26, 256, %s2187_s6, [#allocation4], %s1871_s9, %s1871_s9, %s1872_s10  }
0x1171   :  { %1852 = dma.done.wait [#allocation4], 256  }
0x1172   :  { %1853 = vsyncadd [#allocation4], 4294967040 }
0x1173   :  { %1467 = vsyncpa [#allocation3], 1 }
0x1174   :  { %1468 = vsyncpa [#allocation6], 1 }
0x1175   :  { %1469 = vsyncpa [#allocation4], 1 }

</bundles_post_ra>
